<compile_context>
chip_gen: v6e
topology: v6e:2x2x1
jax: 0.10.0
libtpu: 0.0.40
codegen_flags: <defaults>
</compile_context>

<pallas_src>
import functools

import jax
import jax.numpy as jnp
from jax.experimental import pallas as pl
from jax.experimental.pallas import tpu as pltpu


def _softplus(x):
    # numerically-stable softplus (== jax.nn.softplus); exp/log run on the EUP slot
    return jnp.logaddexp(x, 0.0)


# ----------------------------------------------------------------------------
# Kernel: whole ensemble forward for one batch tile.
#   x_ref    : (TB, D)          float32
#   slab_ref : (rows, lanes)    float32  -- all packed weights/biases/S matrix
#   out_ref  : (TB, 4*O)        float32  -- [mean | var | alea | epis]
# ----------------------------------------------------------------------------
def ensemble_kernel(x_ref, slab_ref, out_ref, *, d, m, h1, h2, o,
                    o_w1, o_b1, o_w2, o_b2, o_wh, o_bh, o_s):
    mh1 = m * h1
    mh2 = m * h2
    mo = m * o

    x = x_ref[...]                                                  # (TB, D)

    # static slices into the single VMEM weight slab (offsets are sublane-aligned)
    w1 = slab_ref[o_w1:o_w1 + d, :mh1]                              # (D, M*H1)
    b1 = slab_ref[o_b1:o_b1 + 1, :mh1]                              # (1, M*H1)
    w2 = slab_ref[o_w2:o_w2 + mh1, :mh2]                            # (M*H1, M*H2) block-diag
    b2 = slab_ref[o_b2:o_b2 + 1, :mh2]                              # (1, M*H2)
    wh = slab_ref[o_wh:o_wh + mh2, :2 * mo]                         # (M*H2, 2*M*O) block-diag
    bh = slab_ref[o_bh:o_bh + 1, :2 * mo]                           # (1, 2*M*O)
    s = slab_ref[o_s:o_s + mo, :o]                                  # (M*O, O) tiled identity

    # 3 lane-packed matmuls for the entire ensemble
    h1v = jnp.tanh(jnp.dot(x, w1, preferred_element_type=jnp.float32) + b1)
    h2v = jnp.tanh(jnp.dot(h1v, w2, preferred_element_type=jnp.float32) + b2)
    heads = jnp.dot(h2v, wh, preferred_element_type=jnp.float32) + bh  # (TB, 2*M*O)

    # grouped head layout: [all mu | all var]  ->  one softplus for the whole var block
    mu = heads[:, :mo]                                              # (TB, M*O)
    v = _softplus(heads[:, mo:]) + 1e-6                             # (TB, M*O)

    # ensemble reduction on the MXU via the constant summation matrix S
    sum_mu = jnp.dot(mu, s, preferred_element_type=jnp.float32)          # (TB, O)
    sum_mu2 = jnp.dot(mu * mu, s, preferred_element_type=jnp.float32)    # (TB, O)
    sum_v2 = jnp.dot(v * v, s, preferred_element_type=jnp.float32)       # (TB, O)

    inv_m = jnp.float32(1.0 / m)
    mean = sum_mu * inv_m
    alea = sum_v2 * inv_m
    epis = sum_mu2 * inv_m - mean * mean   # matches reference; may be ~-eps
    var = alea + epis

    # one lane-packed store
    out_ref[...] = jnp.concatenate([mean, var, alea, epis], axis=1)


# ----------------------------------------------------------------------------
# One-time host-side packing (call once, reuse the slab for every forward).
# ----------------------------------------------------------------------------
def pack_params(params):
    w1, b1, w2, b2 = params["w1"], params["b1"], params["w2"], params["b2"]
    wmu, bmu, wv, bv = params["wmu"], params["bmu"], params["wv"], params["bv"]
    M, D, H1 = w1.shape
    H2 = w2.shape[2]
    O = wmu.shape[2]

    # layer 1: (D, M*H1), model-major along columns
    w1p = jnp.transpose(w1, (1, 0, 2)).reshape(D, M * H1)
    b1p = b1.reshape(1, M * H1)

    eye = jnp.eye(M, dtype=jnp.float32)
    # layer 2: block-diagonal (M*H1, M*H2)
    w2bd = (eye[:, None, :, None] * w2[:, :, None, :]).reshape(M * H1, M * H2)
    b2p = b2.reshape(1, M * H2)

    # heads grouped by head type: columns = [mu_0..mu_{M-1} | var_0..var_{M-1}]
    wmubd = (eye[:, None, :, None] * wmu[:, :, None, :]).reshape(M * H2, M * O)
    wvbd = (eye[:, None, :, None] * wv[:, :, None, :]).reshape(M * H2, M * O)
    whbd = jnp.concatenate([wmubd, wvbd], axis=1)                  # (M*H2, 2*M*O)
    bhp = jnp.concatenate([bmu.reshape(1, M * O), bv.reshape(1, M * O)], axis=1)

    # model-summation matrix: (M*O, O) stack of identities
    s_mat = jnp.tile(jnp.eye(O, dtype=jnp.float32), (M, 1))

    # ---- pack everything into one lane-aligned f32 slab -------------------
    max_w = max(M * H1, M * H2, 2 * M * O, O)
    lanes = ((max_w + 127) // 128) * 128

    def pad(a):
        r, c = a.shape
        rp = ((r + 7) // 8) * 8
        return jnp.pad(a, ((0, rp - r), (0, lanes - c)))

    pieces = [w1p, b1p, w2bd, b2p, whbd, bhp, s_mat]
    padded, offsets, off = [], [], 0
    for p in pieces:
        offsets.append(off)
        q = pad(p)
        padded.append(q)
        off += q.shape[0]
    slab = jnp.concatenate(padded, axis=0).astype(jnp.float32)

    meta = dict(d=D, m=M, h1=H1, h2=H2, o=O,
                o_w1=offsets[0], o_b1=offsets[1], o_w2=offsets[2],
                o_b2=offsets[3], o_wh=offsets[4], o_bh=offsets[5],
                o_s=offsets[6])
    return slab, meta


# ----------------------------------------------------------------------------
# Forward factory. batch_tile: add a parallel grid over B when B > batch_tile
# (keeps weights resident; on v7x this engages the second TensorCore).
# ----------------------------------------------------------------------------
def make_forward(meta, batch_tile=None):
    kernel = functools.partial(ensemble_kernel, **meta)
    m, h1, h2, o = meta["m"], meta["h1"], meta["h2"], meta["o"]

    def fwd(x, slab):
        B, D = x.shape
        mh1, mh2, mo = m * h1, m * h2, m * o
        cost = pl.CostEstimate(
            flops=2 * B * (D * mh1 + mh1 * mh2 + mh2 * 2 * mo + 3 * mo * o),
            transcendentals=B * (mh1 + mh2 + 2 * mo),
            bytes_accessed=4 * (B * D + int(slab.size) + B * 4 * o),
        )
        out_shape = jax.ShapeDtypeStruct((B, 4 * o), jnp.float32)

        if batch_tile is None or B <= batch_tile or B % batch_tile != 0:
            # whole problem lives in VMEM for a single invocation
            out = pl.pallas_call(
                kernel,
                out_shape=out_shape,
                in_specs=[pl.BlockSpec(memory_space=pltpu.MemorySpace.VMEM),
                          pl.BlockSpec(memory_space=pltpu.MemorySpace.VMEM)],
                out_specs=pl.BlockSpec(memory_space=pltpu.MemorySpace.VMEM),
                cost_estimate=cost,
            )(x, slab)
        else:
            # parallel batch grid: x/out tiles pipeline, weight slab stays resident
            out = pl.pallas_call(
                kernel,
                out_shape=out_shape,
                grid=(B // batch_tile,),
                in_specs=[pl.BlockSpec((batch_tile, D), lambda i: (i, 0)),
                          pl.BlockSpec(slab.shape, lambda i: (0, 0))],
                out_specs=pl.BlockSpec((batch_tile, 4 * o), lambda i: (i, 0)),
                cost_estimate=cost,
                compiler_params=pltpu.CompilerParams(
                    dimension_semantics=("parallel",)),
            )(x, slab)

        return out[:, :o], out[:, o:2 * o], out[:, 2 * o:3 * o], out[:, 3 * o:]

    return jax.jit(fwd)


# ----------------------------------------------------------------------------
# Pure-JAX reference matching DeepEnsemble.forward semantics.
# ----------------------------------------------------------------------------
def _reference_forward(x, params):
    w1, b1, w2, b2 = params["w1"], params["b1"], params["w2"], params["b2"]
    wmu, bmu, wv, bv = params["wmu"], params["bmu"], params["wv"], params["bv"]
    M = w1.shape[0]
    means, varis = [], []
    for m in range(M):
        h1 = jnp.tanh(x @ w1[m] + b1[m])
        h2 = jnp.tanh(h1 @ w2[m] + b2[m])
        mu = h2 @ wmu[m] + bmu[m]
        v = jax.nn.softplus(h2 @ wv[m] + bv[m]) + 1e-6
        means.append(mu)
        varis.append(v)
    means = jnp.stack(means, axis=-1)
    varis = jnp.stack(varis, axis=-1)
    mean = jnp.mean(means, axis=-1)
    alea = jnp.mean(varis ** 2, axis=-1)
    epis = jnp.mean(means ** 2, axis=-1) - mean ** 2
    return mean, alea + epis, alea, epis


def _init_params(key, num_models, input_dim, h1, h2, output_dim):
    ks = jax.random.split(key, 8)
    scale = 0.3
    return {
        "w1": scale * jax.random.normal(ks[0], (num_models, input_dim, h1), jnp.float32),
        "b1": scale * jax.random.normal(ks[1], (num_models, 1, h1), jnp.float32),
        "w2": scale * jax.random.normal(ks[2], (num_models, h1, h2), jnp.float32),
        "b2": scale * jax.random.normal(ks[3], (num_models, 1, h2), jnp.float32),
        "wmu": scale * jax.random.normal(ks[4], (num_models, h2, output_dim), jnp.float32),
        "bmu": scale * jax.random.normal(ks[5], (num_models, 1, output_dim), jnp.float32),
        "wv": scale * jax.random.normal(ks[6], (num_models, h2, output_dim), jnp.float32),
        "bv": scale * jax.random.normal(ks[7], (num_models, 1, output_dim), jnp.float32),
    }


def _check(got, want, name):
    assert jnp.allclose(got, want, atol=1e-4, rtol=1e-4), name


if __name__ == "__main__":
    # M*H1 = M*H2 = 128 -> packed matmuls hit native MXU width on v5e (half-width on v6e/v7x,
    # which is fine: the kernel is latency-bound at these sizes).
    B, D, H1, H2, O, M = 8, 16, 32, 32, 2, 4

    key = jax.random.PRNGKey(0)
    kx, kp, kb = jax.random.split(key, 3)
    x = jax.random.normal(kx, (B, D), jnp.float32)
    params = _init_params(kp, M, D, H1, H2, O)

    # one-time weight packing, reused across calls
    slab, meta = pack_params(params)
    slab = jax.block_until_ready(slab)

    forward = make_forward(meta, batch_tile=256)

    # --- small-batch path (single invocation, no grid) ----------------------
    mean, var, alea, epis = jax.block_until_ready(forward(x, slab))
    r_mean, r_var, r_alea, r_epis = _reference_forward(x, params)
    _check(mean, r_mean, "mean")
    _check(var, r_var, "var")
    _check(alea, r_alea, "alea_var")
    _check(epis, r_epis, "epis_var")

    # --- large-batch path (parallel grid over B, weights resident) ----------
    xb = jax.random.normal(kb, (1024, D), jnp.float32)
    mean, var, alea, epis = jax.block_until_ready(forward(xb, slab))
    r_mean, r_var, r_alea, r_epis = _reference_forward(xb, params)
    _check(mean, r_mean, "mean_big")
    _check(var, r_var, "var_big")
    _check(alea, r_alea, "alea_big")
    _check(epis, r_epis, "epis_big")

    print("KERNEL_OK")
</pallas_src>

<mosaic_0001>
module attributes {stable_mosaic.version = 11 : i64} {
  func.func @ensemble_kernel(%arg0: memref<8x16xf32, #tpu.memory_space<vmem>>, %arg1: memref<304x128xf32, #tpu.memory_space<vmem>>, %arg2: memref<8x8xf32, #tpu.memory_space<vmem>>) attributes {dimension_semantics = [], scalar_prefetch = 0 : i64, scratch_operands = 0 : i64, tpu.core_type = #tpu.core_type<tc>} {
    %c0 = arith.constant 0 : index
    %c0_0 = arith.constant 0 : index
    %0 = vector.load %arg0[%c0, %c0_0] : memref<8x16xf32, #tpu.memory_space<vmem>>, vector<8x16xf32>
    %c0_1 = arith.constant 0 : index
    %c0_2 = arith.constant 0 : index
    %1 = vector.load %arg1[%c0_1, %c0_2] : memref<304x128xf32, #tpu.memory_space<vmem>>, vector<16x128xf32>
    %c16 = arith.constant 16 : index
    %c0_3 = arith.constant 0 : index
    %2 = vector.load %arg1[%c16, %c0_3] : memref<304x128xf32, #tpu.memory_space<vmem>>, vector<1x128xf32>
    %c24 = arith.constant 24 : index
    %c0_4 = arith.constant 0 : index
    %3 = vector.load %arg1[%c24, %c0_4] : memref<304x128xf32, #tpu.memory_space<vmem>>, vector<128x128xf32>
    %c152 = arith.constant 152 : index
    %c0_5 = arith.constant 0 : index
    %4 = vector.load %arg1[%c152, %c0_5] : memref<304x128xf32, #tpu.memory_space<vmem>>, vector<1x128xf32>
    %c160 = arith.constant 160 : index
    %c0_6 = arith.constant 0 : index
    %5 = vector.load %arg1[%c160, %c0_6] : memref<304x128xf32, #tpu.memory_space<vmem>>, vector<128x16xf32>
    %c288 = arith.constant 288 : index
    %c0_7 = arith.constant 0 : index
    %6 = vector.load %arg1[%c288, %c0_7] : memref<304x128xf32, #tpu.memory_space<vmem>>, vector<1x16xf32>
    %c296 = arith.constant 296 : index
    %c0_8 = arith.constant 0 : index
    %7 = vector.load %arg1[%c296, %c0_8] : memref<304x128xf32, #tpu.memory_space<vmem>>, vector<8x2xf32>
    %cst = arith.constant dense<0.000000e+00> : vector<8x128xf32>
    %8 = tpu.matmul %0, %1, %cst {dimension_numbers = #tpu.dot_dimension_numbers<[1], [0], [0], [1], [0, 0, 1, 1], [], []>} : vector<8x16xf32>, vector<16x128xf32>, vector<8x128xf32> -> vector<8x128xf32>
    %9 = vector.broadcast %2 : vector<1x128xf32> to vector<8x128xf32>
    %10 = arith.addf %8, %9 : vector<8x128xf32>
    %11 = math.tanh %10 : vector<8x128xf32>
    %cst_9 = arith.constant dense<0.000000e+00> : vector<8x128xf32>
    %12 = tpu.matmul %11, %3, %cst_9 {dimension_numbers = #tpu.dot_dimension_numbers<[1], [0], [0], [1], [0, 0, 1, 1], [], []>} : vector<8x128xf32>, vector<128x128xf32>, vector<8x128xf32> -> vector<8x128xf32>
    %13 = vector.broadcast %4 : vector<1x128xf32> to vector<8x128xf32>
    %14 = arith.addf %12, %13 : vector<8x128xf32>
    %15 = math.tanh %14 : vector<8x128xf32>
    %cst_10 = arith.constant dense<0.000000e+00> : vector<8x16xf32>
    %16 = tpu.matmul %15, %5, %cst_10 {dimension_numbers = #tpu.dot_dimension_numbers<[1], [0], [0], [1], [0, 0, 1, 1], [], []>} : vector<8x128xf32>, vector<128x16xf32>, vector<8x16xf32> -> vector<8x16xf32>
    %17 = vector.broadcast %6 : vector<1x16xf32> to vector<8x16xf32>
    %18 = arith.addf %16, %17 : vector<8x16xf32>
    %19 = vector.extract_strided_slice %18 {offsets = [0, 0], sizes = [8, 8], strides = [1, 1]} : vector<8x16xf32> to vector<8x8xf32>
    %20 = vector.extract_strided_slice %18 {offsets = [0, 8], sizes = [8, 8], strides = [1, 1]} : vector<8x16xf32> to vector<8x8xf32>
    %cst_11 = arith.constant 0.000000e+00 : f32
    %21 = vector.broadcast %cst_11 : f32 to vector<8x8xf32>
    %22 = arith.maximumf %20, %21 : vector<8x8xf32>
    %23 = vector.broadcast %cst_11 : f32 to vector<8x8xf32>
    %24 = arith.subf %20, %23 : vector<8x8xf32>
    %25 = arith.cmpf one, %24, %24 : vector<8x8xf32>
    %26 = vector.broadcast %cst_11 : f32 to vector<8x8xf32>
    %27 = arith.addf %20, %26 : vector<8x8xf32>
    %28 = math.absf %24 : vector<8x8xf32>
    %cst_12 = arith.constant 0.000000e+00 : f32
    %29 = vector.broadcast %cst_12 : f32 to vector<8x8xf32>
    %30 = arith.subf %29, %28 : vector<8x8xf32>
    %31 = math.exp %30 : vector<8x8xf32>
    %32 = math.log1p %31 : vector<8x8xf32>
    %33 = arith.addf %22, %32 : vector<8x8xf32>
    %34 = arith.select %25, %27, %33 : vector<8x8xi1>, vector<8x8xf32>
    %cst_13 = arith.constant 9.99999997E-7 : f32
    %35 = vector.broadcast %cst_13 : f32 to vector<8x8xf32>
    %36 = arith.addf %34, %35 : vector<8x8xf32>
    %cst_14 = arith.constant dense<0.000000e+00> : vector<8x2xf32>
    %37 = tpu.matmul %19, %7, %cst_14 {dimension_numbers = #tpu.dot_dimension_numbers<[1], [0], [0], [1], [0, 0, 1, 1], [], []>} : vector<8x8xf32>, vector<8x2xf32>, vector<8x2xf32> -> vector<8x2xf32>
    %38 = arith.mulf %19, %19 : vector<8x8xf32>
    %cst_15 = arith.constant dense<0.000000e+00> : vector<8x2xf32>
    %39 = tpu.matmul %38, %7, %cst_15 {dimension_numbers = #tpu.dot_dimension_numbers<[1], [0], [0], [1], [0, 0, 1, 1], [], []>} : vector<8x8xf32>, vector<8x2xf32>, vector<8x2xf32> -> vector<8x2xf32>
    %40 = arith.mulf %36, %36 : vector<8x8xf32>
    %cst_16 = arith.constant dense<0.000000e+00> : vector<8x2xf32>
    %41 = tpu.matmul %40, %7, %cst_16 {dimension_numbers = #tpu.dot_dimension_numbers<[1], [0], [0], [1], [0, 0, 1, 1], [], []>} : vector<8x8xf32>, vector<8x2xf32>, vector<8x2xf32> -> vector<8x2xf32>
    %cst_17 = arith.constant 2.500000e-01 : f32
    %42 = vector.broadcast %cst_17 : f32 to vector<8x2xf32>
    %43 = arith.mulf %37, %42 : vector<8x2xf32>
    %cst_18 = arith.constant 2.500000e-01 : f32
    %44 = vector.broadcast %cst_18 : f32 to vector<8x2xf32>
    %45 = arith.mulf %41, %44 : vector<8x2xf32>
    %cst_19 = arith.constant 2.500000e-01 : f32
    %46 = vector.broadcast %cst_19 : f32 to vector<8x2xf32>
    %47 = arith.mulf %39, %46 : vector<8x2xf32>
    %48 = arith.mulf %43, %43 : vector<8x2xf32>
    %49 = arith.subf %47, %48 : vector<8x2xf32>
    %50 = arith.addf %45, %49 : vector<8x2xf32>
    %51 = tpu.concatenate %43, %50, %45, %49 in 1 : vector<8x2xf32>, vector<8x2xf32>, vector<8x2xf32>, vector<8x2xf32> -> vector<8x8xf32>
    %c0_20 = arith.constant 0 : index
    %c0_21 = arith.constant 0 : index
    %52 = vector.load %arg2[%c0_20, %c0_21] : memref<8x8xf32, #tpu.memory_space<vmem>>, vector<8x8xf32>
    tpu.vector_store %arg2[%c0_20, %c0_21], %51 {strides = array<i32>} : memref<8x8xf32, #tpu.memory_space<vmem>>, vector<8x8xf32>,
    return
  }
}

</mosaic_0001>

<bundles_post_ra>
// kernel: fwd.1
= control target key start
LH: loop header
LB: loop body
LE: loop exit
PB: predicated region body
PF: predicated region fallthrough
CT: control target
= control target key end

     0   :  { %7 = vsyncpa [#allocation3], 0  ;;  %s869_s0 = inlined_call_operand.hbm [shape: f32[8,16], index: 0, kind: input, shape index: {}]   ;;  %s870_s1 = inlined_call_operand.hbm [shape: f32[304,128], index: 1, kind: input, shape index: {}]   ;;  %s871_s2 = inlined_call_operand.vmem [shape: f32[8,8], index: 2, kind: output, shape index: {}]  }
   0x1   :  { %8 = vsyncpa [#allocation5], 0  ;;  %s782_s9 = smov [#allocation2]   ;;  %s783_s11 = smov [#allocation4]  }
   0x2   :  { %s15_s10 = sshll.u32 %s782_s9, 4  ;;  %s24_s12 = sshll.u32 %s783_s11, 4  ;;  %s16_s10 = int_to_ptr.vmem [resolvable:$true] %s15_s10  ;;  %s25_s12 = int_to_ptr.vmem [resolvable:$true] %s24_s12 }
   0x3   :  { %s746_s13 = scalar_lea.vmem %s16_s10, 128  ;;  %p751_p1 = scmp.lt.s32.totalorder %s16_s10, %s16_s10 }
   0x4   :  { %p747_p0 = scmp.ne.s32.totalorder %s16_s10, %s746_s13  ;;  %p752_p2 = scmp.lt.s32.totalorder %s746_s13, %s746_s13 }
   0x6   :  { %p753_p3 = por %p752_p2, %p751_p1 }
   0x8   :  { %p754_p4 = pnand %p753_p3, %p747_p0 }
   0xa   :  { %757 = shalt.err (!%p754_p4)
}
   0xb   :  { %18 = dma.hbm_to_vmem [thread:$0]  %s869_s0, 128, %s16_s10, [#allocation3]  }
   0xc   :  { %s766_s16 = scalar_lea.vmem %s25_s12, 4864  ;;  %p771_p6 = scmp.lt.s32.totalorder %s25_s12, %s25_s12 }
   0xd   :  { %p767_p5 = scmp.ne.s32.totalorder %s25_s12, %s766_s16  ;;  %p772_p7 = scmp.lt.s32.totalorder %s766_s16, %s766_s16 }
   0xf   :  { %p773_p8 = por %p772_p7, %p771_p6 }
  0x11   :  { %p774_p9 = pnand %p773_p8, %p767_p5 }
  0x13   :  { %777 = shalt.err (!%p774_p9)
}
  0x14   :  { %s784_s17 = smov 128   ;;  %s785_s18 = smov 8  }
  0x15   :  { %30 = dma.hbm_to_vmem [thread:$0]  %s870_s1, 4864, %s25_s12, [#allocation5], %s784_s17, %s784_s17, %s785_s18  }
  0x16   :  { %778 = dma.done.wait [#allocation3], 128  }
  0x17   :  { %779 = vsyncadd [#allocation3], 4294967168 }
  0x18   :  { %780 = dma.done.wait [#allocation5], 4864  }
  0x19   :  { %781 = vsyncadd [#allocation5], 4294962432  ;;  %v786_v0 = vmov 0.0   ;;  %vm787_vm0 = vmmov 0   ;;  %v39_v1 = vld [vmem:[#allocation4 + $0x8] sm:$0xff]  ;;  %v38_v2 = vld [vmem:[#allocation4] sm:$0xff] }
  0x1a   :  { %628 = vmatprep.subr.mxu0 %v786_v0  ;;  %632 = vmatprep.mubr.msk.f32.mxu0 %vm787_vm0, %v786_v0  ;;  %v37_v3 = vld [vmem:[#allocation2] sm:$0xff]  ;;  %vm80_vm1 = vcmask 130048   ;;  %v56_v4 = vld [vmem:[#allocation4 + $0x90] sm:$0xff]  ;;  %v55_v5 = vld [vmem:[#allocation4 + $0x88] sm:$0xff]  ;;  %vm323_vm2 = vcmask 64512   ;;  %s788_s0 = smov 120  }
  0x1b   :  { %635 = vmatprep.subr.mxu1 %v786_v0  ;;  %667 = vmatprep.mubr.msk.f32.mxu1 %vm787_vm0, %v786_v0  ;;  %v54_v6 = vld [vmem:[#allocation4 + $0x80] sm:$0xff]  ;;  %v53_v7 = vld [vmem:[#allocation4 + $0x78] sm:$0xff]  ;;  %v52_v8 = vld [vmem:[#allocation4 + $0x70] sm:$0xff]  ;;  %s789_s1 = smov 4   ;;  %s790_s21 = smov 2   ;;  %vm565_vm5 = vcmask 15360  }
  0x1c   :  { %629 = vmatpush3.msra.mxu0 %v39_v1  ;;  %636 = vmatpush3.msra.mxu1 %v56_v4  ;;  %v51_v9 = vld [vmem:[#allocation4 + $0x68] sm:$0xff]  ;;  %v50_v10 = vld [vmem:[#allocation4 + $0x60] sm:$0xff]  ;;  %v49_v11 = vld [vmem:[#allocation4 + $0x58] sm:$0xff]  ;;  %s791_s22 = smov 6   ;;  %vm567_vm6 = vcmask 31744   ;;  %vm569_vm7 = vcmask 48128  }
  0x1d   :  { %630 = vmatprep.subr.mxu0 %v786_v0  ;;  %637 = vmatprep.subr.mxu1 %v786_v0  ;;  %v48_v12 = vld [vmem:[#allocation4 + $0x50] sm:$0xff]  ;;  %v47_v13 = vld [vmem:[#allocation4 + $0x48] sm:$0xff]  ;;  %v46_v14 = vld [vmem:[#allocation4 + $0x40] sm:$0xff] }
  0x1e   :  { %631 = vmatpush3.msra.mxu0 %v38_v2  ;;  %638 = vmatpush3.msra.mxu1 %v55_v5  ;;  %v45_v15 = vld [vmem:[#allocation4 + $0x38] sm:$0xff]  ;;  %v44_v16 = vld [vmem:[#allocation4 + $0x30] sm:$0xff]  ;;  %v43_v17 = vld [vmem:[#allocation4 + $0x28] sm:$0xff] }
  0x1f   :  { %633 = vmatmul.mubr.msk.f32.vlgmr.msra.gmra.mxu0 %vm80_vm1, %v37_v3  ;;  %639 = vmatprep.subr.mxu1 %v786_v0  ;;  %v42_v18 = vld [vmem:[#allocation4 + $0x20] sm:$0xff]  ;;  %v41_v19 = vld [vmem:[#allocation4 + $0x18] sm:$0xff]  ;;  %v72_v21 = vld [vmem:[#allocation4 + $0x110] sm:$0xff] }
  0x20   :  { %670 = vmatprep.subr.mxu0 %v786_v0  ;;  %640 = vmatpush3.msra.mxu1 %v54_v6  ;;  %v73_v20 = vld [vmem:[#allocation4 + $0x118] sm:$0xff]  ;;  %v71_v22 = vld [vmem:[#allocation4 + $0x108] sm:$0xff]  ;;  %v70_v23 = vld [vmem:[#allocation4 + $0x100] sm:$0xff] }
  0x21   :  { %702 = vmatprep.mubr.msk.f32.mxu0 %vm787_vm0, %v786_v0  ;;  %641 = vmatprep.subr.mxu1 %v786_v0  ;;  %v69_v24 = vld [vmem:[#allocation4 + $0xf8] sm:$0xff]  ;;  %v68_v25 = vld [vmem:[#allocation4 + $0xf0] sm:$0xff]  ;;  %v67_v26 = vld [vmem:[#allocation4 + $0xe8] sm:$0xff] }
  0x22   :  { %642 = vmatpush3.msra.mxu1 %v53_v7  ;;  %671 = vmatpush3.msra.mxu0 %v73_v20  ;;  %v578_v27 = vld [vmem:[#allocation4 + $0x10] ss:$0 sm:$0xff]  ;;  %v66_v32 = vld [vmem:[#allocation4 + $0xe0] sm:$0xff]  ;;  %v65_v33 = vld [vmem:[#allocation4 + $0xd8] sm:$0xff] }
  0x23   :  { %643 = vmatprep.subr.mxu1 %v786_v0  ;;  %672 = vmatprep.subr.mxu0 %v786_v0  ;;  %v64_v34 = vld [vmem:[#allocation4 + $0xd0] sm:$0xff]  ;;  %v63_v35 = vld [vmem:[#allocation4 + $0xc8] sm:$0xff]  ;;  %v62_v36 = vld [vmem:[#allocation4 + $0xc0] sm:$0xff] }
  0x24   :  { %644 = vmatpush3.msra.mxu1 %v52_v8  ;;  %673 = vmatpush3.msra.mxu0 %v72_v21  ;;  %v61_v37 = vld [vmem:[#allocation4 + $0xb8] sm:$0xff]  ;;  %v60_v38 = vld [vmem:[#allocation4 + $0xb0] sm:$0xff]  ;;  %v59_v39 = vld [vmem:[#allocation4 + $0xa8] sm:$0xff] }
  0x25   :  { %645 = vmatprep.subr.mxu1 %v786_v0  ;;  %674 = vmatprep.subr.mxu0 %v786_v0  ;;  %v58_v40 = vld [vmem:[#allocation4 + $0xa0] sm:$0xff]  ;;  %v580_v41 = vld [vmem:[#allocation4 + $0x98] ss:$0 sm:$0xff]  ;;  %v75_v46 = vld [vmem:[#allocation4 + $0x128] sm:$0xff] }
  0x26   :  { %646 = vmatpush3.msra.mxu1 %v51_v9  ;;  %675 = vmatpush3.msra.mxu0 %v71_v22  ;;  %v581_v47 = vld [vmem:[#allocation4 + $0x120] ss:$0 sm:$0xff] }
  0x27   :  { %647 = vmatprep.subr.mxu1 %v786_v0  ;;  %676 = vmatprep.subr.mxu0 %v786_v0 }
  0x28   :  { %648 = vmatpush3.msra.mxu1 %v50_v10  ;;  %677 = vmatpush3.msra.mxu0 %v70_v23 }
  0x29   :  { %649 = vmatprep.subr.mxu1 %v786_v0  ;;  %678 = vmatprep.subr.mxu0 %v786_v0 }
  0x2a   :  { %650 = vmatpush3.msra.mxu1 %v49_v11  ;;  %679 = vmatpush3.msra.mxu0 %v69_v24 }
  0x2b   :  { %651 = vmatprep.subr.mxu1 %v786_v0  ;;  %680 = vmatprep.subr.mxu0 %v786_v0 }
  0x2c   :  { %652 = vmatpush3.msra.mxu1 %v48_v12  ;;  %681 = vmatpush3.msra.mxu0 %v68_v25 }
  0x2d   :  { %653 = vmatprep.subr.mxu1 %v786_v0  ;;  %682 = vmatprep.subr.mxu0 %v786_v0 }
  0x2e   :  { %654 = vmatpush3.msra.mxu1 %v47_v13  ;;  %683 = vmatpush3.msra.mxu0 %v67_v26 }
  0x2f   :  { %655 = vmatprep.subr.mxu1 %v786_v0  ;;  %684 = vmatprep.subr.mxu0 %v786_v0 }
  0x30   :  { %656 = vmatpush3.msra.mxu1 %v46_v14  ;;  %685 = vmatpush3.msra.mxu0 %v66_v32 }
  0x31   :  { %657 = vmatprep.subr.mxu1 %v786_v0  ;;  %686 = vmatprep.subr.mxu0 %v786_v0 }
  0x32   :  { %658 = vmatpush3.msra.mxu1 %v45_v15  ;;  %687 = vmatpush3.msra.mxu0 %v65_v33 }
  0x33   :  { %659 = vmatprep.subr.mxu1 %v786_v0  ;;  %688 = vmatprep.subr.mxu0 %v786_v0 }
  0x34   :  { %660 = vmatpush3.msra.mxu1 %v44_v16  ;;  %689 = vmatpush3.msra.mxu0 %v64_v34 }
  0x35   :  { %661 = vmatprep.subr.mxu1 %v786_v0  ;;  %690 = vmatprep.subr.mxu0 %v786_v0 }
  0x36   :  { %662 = vmatpush3.msra.mxu1 %v43_v17  ;;  %691 = vmatpush3.msra.mxu0 %v63_v35 }
  0x37   :  { %663 = vmatprep.subr.mxu1 %v786_v0  ;;  %692 = vmatprep.subr.mxu0 %v786_v0 }
  0x38   :  { %664 = vmatpush3.msra.mxu1 %v42_v18  ;;  %693 = vmatpush3.msra.mxu0 %v62_v36 }
  0x39   :  { %665 = vmatprep.subr.mxu1 %v786_v0  ;;  %694 = vmatprep.subr.mxu0 %v786_v0 }
  0x3a   :  { %666 = vmatpush3.msra.mxu1 %v41_v19  ;;  %695 = vmatpush3.msra.mxu0 %v61_v37 }
  0x3b   :  { %705 = vmatprep.subr.mxu1 %v786_v0  ;;  %696 = vmatprep.subr.mxu0 %v786_v0 }
  0x3c   :  { %697 = vmatpush3.msra.mxu0 %v60_v38 }
  0x3d   :  { %698 = vmatprep.subr.mxu0 %v786_v0 }
  0x3e   :  { %699 = vmatpush3.msra.mxu0 %v59_v39 }
  0x3f   :  { %700 = vmatprep.subr.mxu0 %v786_v0 }
  0x40   :  { %701 = vmatpush3.msra.mxu0 %v58_v40 }
  0x41   :  { %710 = vmatprep.subr.mxu0 %v786_v0 }
  0xdf   :  { %v150_v28 = vpop.f32.mrf.mxu0 }
  0xe0   :  { %v151_v29 = vadd.f32 %v578_v27, %v150_v28 }
  0xe1   :  { %v634_v30 = vpop.f32.mrf.mxu0 }
  0xe2   :  { %730 = vtanh.f32 %v151_v29 }
  0xef   :  { %v731_v31 = vpop.eup %730 }
  0xf0   :  { %668 = vmatmul.mubr.f32.vlgmr.msra.gmra.mxu1 %v731_v31 }
  0xf1   :  { %707 = vmatprep.mubr.msk.f32.mxu1 %vm787_vm0, %v786_v0  ;;  %706 = vmatpush3.msra.mxu1 %v75_v46 }
  0xf2   :  { %715 = vmatprep.subr.mxu1 %v786_v0 }
 0x1b0   :  { %v225_v42 = vpop.f32.mrf.mxu1 }
 0x1b1   :  { %v226_v43 = vadd.f32 %v580_v41, %v225_v42 }
 0x1b2   :  { %v669_v44 = vpop.f32.mrf.mxu1 }
 0x1b3   :  { %732 = vtanh.f32 %v226_v43 }
 0x1c0   :  { %v733_v45 = vpop.eup %732 }
 0x1c1   :  { %703 = vmatmul.mubr.f32.vlgmr.msra.gmra.mxu0 %v733_v45 }
 0x1c2   :  { %712 = vmatprep.mubr.msk.f32.mxu0 %vm787_vm0, %v786_v0  ;;  %711 = vmatpush3.msra.mxu0 %v75_v46 }
 0x281   :  { %v300_v48 = vpop.f32.mrf.mxu0 }
 0x282   :  { %v301_v49 = vadd.f32 %v581_v47, %v300_v48 }
 0x283   :  { %v704_v50 = vpop.f32.mrf.mxu0 }
 0x284   :  { %v307_v51 = vand.u32 2147483647, %v301_v49  ;;  %708 = vmatmul.mubr.msk.f32.vlgmr.msra.gmra.mxu1 %vm323_vm2, %v301_v49  ;;  %v397_v52 = vmul.f32 %v301_v49, %v301_v49  ;;  %v304_v63 = vmax.f32 %v301_v49, 0.0  ;;  %vm305_vm4 = vcmp.ne.f32.partialorder %v301_v49, %v301_v49 }
 0x285   :  { %716 = vmatpush3.msra.mxu1 %v75_v46  ;;  %717 = vmatprep.mubr.msk.f32.mxu1 %vm787_vm0, %v786_v0 }
 0x286   :  { %v308_v53 = vsub.f32 0.0, %v307_v51  ;;  %713 = vmatmul.mubr.msk.f32.vlgmr.msra.gmra.mxu0 %vm323_vm2, %v397_v52 }
 0x288   :  { %v309_v54 = vmul.f32 1.442695, %v308_v53 }
 0x28a   :  { %734 = vpow2.f32 %v309_v54 }
 0x297   :  { %v735_v55 = vpop.eup %734 }
 0x298   :  { %v311_v56 = vadd.f32 1.0, %v735_v55  ;;  %v314_v57 = vmul.f32 -0.5, %v735_v55  ;;  %v317_v59 = vand.u32 2147483647, %v735_v55 }
 0x29a   :  { %736 = vlog2.f32 %v311_v56  ;;  %v315_v58 = vadd.f32 1.0, %v314_v57  ;;  %vm318_vm3 = vcmp.lt.f32.partialorder %v317_v59, 0.0004427343 }
 0x29c   :  { %v316_v62 = vmul.f32 %v735_v55, %v315_v58 }
 0x2a7   :  { %v737_v60 = vpop.eup %736 }
 0x2a8   :  { %v313_v61 = vmul.f32 0.6931472, %v737_v60 }
 0x2aa   :  { %v319_v1 = vsel %vm318_vm3, %v316_v62, %v313_v61 }
 0x2ab   :  { %v320_v2 = vadd.f32 %v319_v1, %v304_v63 }
 0x2ad   :  { %v321_v0 = vsel %vm305_vm4, %v301_v49, %v320_v2 }
 0x2ae   :  { %v322_v3 = vadd.f32 1e-06, %v321_v0 }
 0x2b0   :  { %v471_v4 = vmul.f32 %v322_v3, %v322_v3 }
 0x2b2   :  { %473 = vrot.lane.b32.xlu0 %v471_v4, %s788_s0 }
 0x324   :  { %v474_v5 = vpop.permute.xlu0 %473 }
 0x325   :  { %718 = vmatmul.mubr.msk.f32.vlgmr.msra.gmra.mxu1 %vm323_vm2, %v474_v5 }
 0x344   :  { %v393_v6 = vpop.f32.mrf.mxu1 }
 0x345   :  { %v547_v10 = vmul.f32 0.25, %v393_v6 }
 0x346   :  { %v709_v7 = vpop.f32.mrf.mxu1  ;;  %v467_v8 = vpop.f32.mrf.mxu0 }
 0x347   :  { %v550_v11 = vmul.f32 %v547_v10, %v547_v10  ;;  %v549_v12 = vmul.f32 0.25, %v467_v8 }
 0x348   :  { %v714_v9 = vpop.f32.mrf.mxu0 }
 0x349   :  { %v551_v14 = vsub.f32 %v549_v12, %v550_v11 }
 0x3e5   :  { %v543_v13 = vpop.f32.mrf.mxu1 }
 0x3e6   :  { %v548_v15 = vmul.f32 0.25, %v543_v13 }
 0x3e7   :  { %v719_v16 = vpop.f32.mrf.mxu1 }
 0x3e8   :  { %v552_v17 = vadd.f32 %v551_v14, %v548_v15  ;;  %558 = vrot.lane.b32.xlu1 %v548_v15, %s789_s1 }
 0x3ea   :  { %554 = vrot.lane.b32.xlu0 %v552_v17, %s790_s21 }
 0x3ec   :  { %562 = vrot.lane.b32.xlu1 %v551_v14, %s791_s22 }
 0x45a   :  { %v559_v18 = vpop.permute.xlu1 %558 }
 0x45c   :  { %v555_v19 = vpop.permute.xlu0 %554 }
 0x45d   :  { %v566_v20 = vsel %vm565_vm5, %v547_v10, %v555_v19 }
 0x45e   :  { %v563_v21 = vpop.permute.xlu1 %562  ;;  %v568_v22 = vsel %vm567_vm6, %v566_v20, %v559_v18 }
 0x45f   :  { %v570_v23 = vsel %vm569_vm7, %v568_v22, %v563_v21 }
 0x460   :  { %571 = vst.msk [vmem:[%s871_s2] sm:$0xff] %vm323_vm2, %v570_v23 }
 0x461   :  { %576 = vsyncpa [#allocation3], 1 }
 0x462   :  { %577 = vsyncpa [#allocation5], 1 }

</bundles_post_ra>
